<compile_context>
chip_gen: v5e
topology: v5e:2x2
jax: 0.10.0
libtpu: 0.0.40
codegen_flags: <defaults>
</compile_context>

<pallas_src>
import math
from typing import NamedTuple

import jax
import jax.numpy as jnp
from jax.experimental import pallas as pl
from jax.experimental.pallas import tpu as pltpu


# ---------------------------------------------------------------------------
# Kernels
# ---------------------------------------------------------------------------

def _xa_kernel(x_ref, a_ref, o_ref, acc_ref):
    """Pre-pass: xA = (x @ A) accumulated in f32 over K, single bf16 cast."""
    k = pl.program_id(1)

    @pl.when(k == 0)
    def _():
        acc_ref[...] = jnp.zeros_like(acc_ref)

    acc_ref[...] += jnp.dot(x_ref[...], a_ref[...],
                            preferred_element_type=jnp.float32)

    @pl.when(k == pl.num_programs(1) - 1)
    def _():
        o_ref[...] = acc_ref[...].astype(o_ref.dtype)


def _lora_linear_kernel(x_ref, wt_ref, xa_ref, b_ref, o_ref, acc_ref):
    # x_ref:  (tm, tk) bf16      wt_ref: (tk, tn) bf16 (pre-transposed W)
    # xa_ref: (tm, r_pad) bf16   b_ref:  (r_pad, tn) bf16 (pre-scaled by 2)
    # o_ref:  (tm, tn) bf16      acc_ref: (tm, tn) f32 scratch
    k = pl.program_id(2)

    @pl.when(k == 0)
    def _():
        acc_ref[...] = jnp.zeros_like(acc_ref)

    # Frozen-weight path: accumulate x @ W^T over K tiles (f32 on the MXU).
    acc_ref[...] += jnp.dot(x_ref[...], wt_ref[...],
                            preferred_element_type=jnp.float32)

    @pl.when(k == pl.num_programs(2) - 1)
    def _():
        # LoRA second matmul only; scale 2 is already folded into B.
        lora = jnp.dot(xa_ref[...], b_ref[...],
                       preferred_element_type=jnp.float32)
        o_ref[...] = (acc_ref[...] + lora).astype(o_ref.dtype)


# ---------------------------------------------------------------------------
# Tiling helpers
# ---------------------------------------------------------------------------

_LANE = 128


def _round_up(x, m):
    return ((x + m - 1) // m) * m


def _tile_targets():
    """Generation-aware (tm, tn, tk, vmem_cap) targets."""
    kind = ""
    try:
        kind = jax.devices()[0].device_kind.lower()
    except Exception:  # pragma: no cover - defensive
        pass
    if "v5 lite" in kind or "v5e" in kind or "v5lite" in kind:
        # v5e ridge ~240 FLOP/B; tm=tn=512 crosses it within ~5 MiB of VMEM.
        return 512, 512, 512, 100 * 1024 * 1024
    if "v6" in kind:
        # v6e ridge ~600-700 FLOP/B; needs big tiles + raised scoped VMEM.
        return 1024, 2048, 512, 100 * 1024 * 1024
    # v7x (64 MiB physical VMEM, ~3.2 TB/s HBM, ridge ~310 FLOP/B) and
    # unknown chips: modest tiles already reach compute-bound.
    return 512, 1024, 512, 56 * 1024 * 1024


def _pick_m_tile(m, target):
    """M tile: big (target) for real workloads, rounded-up-to-16 for small M."""
    if m >= target:
        return target
    return _round_up(max(m, 1), 16)  # bf16 sublane packing multiple


def _pick_divisor_tile(dim, target):
    """N/K tile: full dim if small, else the largest standard tile dividing it.

    `dim` is always a multiple of 128 here (padded at setup), so 128 always
    divides it and no full-extent fallback is ever needed.
    """
    if dim <= target:
        return dim
    for cand in sorted({target, 2048, 1024, 512, 256, 128}, reverse=True):
        if cand <= target and cand <= dim and dim % cand == 0:
            return cand
    return 128  # unreachable for 128-multiple dims


def _vmem_limit(tm, tn, tk, r_pad, cap):
    """Scoped VMEM budget for the main kernel (double-buffered pipeline)."""
    est = (tm * tn * 4            # f32 accumulator scratch
           + 2 * tm * tk * 2      # x tiles (double-buffered, bf16)
           + 2 * tk * tn * 2      # W^T tiles
           + 2 * tm * r_pad * 2   # xA tiles
           + 2 * r_pad * tn * 2   # B tiles
           + 2 * tm * tn * 2)     # output tiles
    return int(min(max(2 * est, 32 * 1024 * 1024), cap))


# ---------------------------------------------------------------------------
# Parameter preparation (one-time, cached with the params)
# ---------------------------------------------------------------------------

class LoraParams(NamedTuple):
    w_t: jnp.ndarray      # (in_f_pad, out_f_pad) bf16, pre-transposed W
    lora_A: jnp.ndarray   # (in_f_pad, r_pad) bf16, zero-padded columns
    lora_B: jnp.ndarray   # (r_pad, out_f_pad) bf16, zero-padded rows, x2 folded in
    in_features: int
    out_features: int


def prepare_params(weight, lora_A, lora_B, *, scale=2.0):
    """One-time setup: transpose W, pad dims to multiples of 128, fold scale.

    Do this when parameters are created/loaded and cache the result; it is
    NOT paid on every forward call.
    """
    weight = jnp.asarray(weight)
    lora_A = jnp.asarray(lora_A)
    lora_B = jnp.asarray(lora_B)
    out_f, in_f = weight.shape
    r = lora_A.shape[1]

    in_f_pad = _round_up(in_f, _LANE)
    out_f_pad = _round_up(out_f, _LANE)
    r_pad = _round_up(r, _LANE)

    w_t = jnp.zeros((in_f_pad, out_f_pad), weight.dtype)
    w_t = w_t.at[:in_f, :out_f].set(weight.T)

    a_p = jnp.zeros((in_f_pad, r_pad), lora_A.dtype)
    a_p = a_p.at[:in_f, :r].set(lora_A)

    # Scaling by 2 is exact in bf16, so folding it into B changes nothing.
    b_scaled = (scale * lora_B.astype(jnp.float32)).astype(lora_B.dtype)
    b_p = jnp.zeros((r_pad, out_f_pad), lora_B.dtype)
    b_p = b_p.at[:r, :out_f].set(b_scaled)

    return LoraParams(w_t=w_t, lora_A=a_p, lora_B=b_p,
                      in_features=in_f, out_features=out_f)


# ---------------------------------------------------------------------------
# Forward
# ---------------------------------------------------------------------------

def _xa_prepass(x2d, a_pad, *, tm, tk):
    """xA = (x @ A).astype(bf16), computed once per call (not per N tile)."""
    m_pad, in_f_pad = x2d.shape
    r_pad = a_pad.shape[1]
    grid = (m_pad // tm, in_f_pad // tk)
    return pl.pallas_call(
        _xa_kernel,
        out_shape=jax.ShapeDtypeStruct((m_pad, r_pad), x2d.dtype),
        grid_spec=pltpu.PrefetchScalarGridSpec(
            num_scalar_prefetch=0,
            grid=grid,
            in_specs=[
                pl.BlockSpec((tm, tk), lambda i, k: (i, k)),     # x
                pl.BlockSpec((tk, r_pad), lambda i, k: (k, 0)),  # A (padded)
            ],
            out_specs=pl.BlockSpec((tm, r_pad), lambda i, k: (i, 0)),
            scratch_shapes=[pltpu.VMEM((tm, r_pad), jnp.float32)],
        ),
        compiler_params=pltpu.CompilerParams(
            dimension_semantics=("parallel", "arbitrary")),
    )(x2d, a_pad)


def linear_lora_forward(x, params: LoraParams, *, tm=None, tn=None, tk=None):
    """x: (..., in_features); params from prepare_params()."""
    in_f_pad, out_f_pad = params.w_t.shape
    r_pad = params.lora_A.shape[1]
    in_f, out_f = params.in_features, params.out_features
    assert x.shape[-1] == in_f

    lead_shape = x.shape[:-1]
    x2d = x.reshape(-1, in_f)
    m = x2d.shape[0]

    tm_t, tn_t, tk_t, vmem_cap = _tile_targets()
    tm = tm if tm is not None else _pick_m_tile(m, tm_t)
    tn = tn if tn is not None else _pick_divisor_tile(out_f_pad, tn_t)
    tk = tk if tk is not None else _pick_divisor_tile(in_f_pad, tk_t)

    m_pad = _round_up(m, tm)
    pad_m = m_pad - m
    pad_k = in_f_pad - in_f
    if pad_m or pad_k:
        x2d = jnp.pad(x2d, ((0, pad_m), (0, pad_k)))

    # LoRA first matmul hoisted out of the (i, j, k) grid.
    xa = _xa_prepass(x2d, params.lora_A, tm=tm, tk=tk)  # (m_pad, r_pad) bf16

    grid = (m_pad // tm, out_f_pad // tn, in_f_pad // tk)
    # TODO(synk): on v7x, if the profile shows exposed W^T DMA, add
    # pipeline_mode=pl.Buffered(3) on the W^T BlockSpec (and optionally fp8 W).
    out2d = pl.pallas_call(
        _lora_linear_kernel,
        out_shape=jax.ShapeDtypeStruct((m_pad, out_f_pad), x.dtype),
        grid_spec=pltpu.PrefetchScalarGridSpec(
            num_scalar_prefetch=0,
            grid=grid,
            in_specs=[
                pl.BlockSpec((tm, tk), lambda i, j, k: (i, k)),       # x
                pl.BlockSpec((tk, tn), lambda i, j, k: (k, j)),       # W^T
                pl.BlockSpec((tm, r_pad), lambda i, j, k: (i, 0)),    # xA
                pl.BlockSpec((r_pad, tn), lambda i, j, k: (0, j)),    # B (x2)
            ],
            out_specs=pl.BlockSpec((tm, tn), lambda i, j, k: (i, j)),
            scratch_shapes=[pltpu.VMEM((tm, tn), jnp.float32)],       # f32 acc
        ),
        compiler_params=pltpu.CompilerParams(
            dimension_semantics=("parallel", "parallel", "arbitrary"),
            vmem_limit_bytes=_vmem_limit(tm, tn, tk, r_pad, vmem_cap)),
    )(x2d, params.w_t, xa, params.lora_B)

    return out2d[:m, :out_f].reshape(*lead_shape, out_f)


# ---------------------------------------------------------------------------
# Init + reference + self-test
# ---------------------------------------------------------------------------

def init_params(key, in_features, out_features, r=16):
    kw, ka = jax.random.split(key)
    # Frozen weight (would normally come from the wrapped nn.Linear).
    weight = (jax.random.normal(kw, (out_features, in_features), jnp.float32)
              * (1.0 / math.sqrt(in_features))).astype(jnp.bfloat16)
    # kaiming_uniform_(a=sqrt(5)) on (in_features, r): fan_in=r,
    # gain=sqrt(1/3), bound=gain*sqrt(3/fan_in).
    bound = math.sqrt(1.0 / 3.0) * math.sqrt(3.0 / r)
    lora_A = jax.random.uniform(ka, (in_features, r), jnp.float32,
                                minval=-bound, maxval=bound).astype(jnp.bfloat16)
    lora_B = jnp.zeros((r, out_features), jnp.bfloat16)  # module init: zeros
    return weight, lora_A, lora_B


def _reference(x, weight, lora_A, lora_B):
    # Plain-JAX reference. Note: the kernel keeps the B matmul and the final
    # add in f32 with a single bf16 cast (slightly more accurate than bit-wise
    # PyTorch bf16 chaining); the reference mirrors the kernel's rounding.
    xf = x.astype(jnp.float32)
    base = jnp.dot(xf, weight.T.astype(jnp.float32))
    xa = jnp.dot(xf, lora_A.astype(jnp.float32)).astype(jnp.bfloat16)
    lora = jnp.dot(xa.astype(jnp.float32), lora_B.astype(jnp.float32))
    return (base + 2.0 * lora).astype(jnp.bfloat16)


def _run_case(key, batch, seq, in_features, out_features, r, **tiles):
    k_x, k_p, k_b = jax.random.split(key, 3)
    x = jax.random.normal(
        k_x, (batch, seq, in_features), jnp.float32).astype(jnp.bfloat16)
    weight, lora_A, lora_B = init_params(k_p, in_features, out_features, r)
    # The module inits lora_B to zeros (LoRA contributes nothing at step 0);
    # use a random lora_B here purely so the check exercises the LoRA path.
    lora_B = (jax.random.normal(k_b, (r, out_features), jnp.float32)
              * 0.05).astype(jnp.bfloat16)

    params = prepare_params(weight, lora_A, lora_B)  # cached setup, not per call

    out = linear_lora_forward(x, params, **tiles)
    out = jax.block_until_ready(out)

    ref = _reference(x, weight, lora_A, lora_B)
    assert out.shape == (batch, seq, out_features)
    assert jnp.allclose(out.astype(jnp.float32), ref.astype(jnp.float32),
                        atol=1e-1, rtol=1e-1), "mismatch vs reference"


if __name__ == "__main__":
    key = jax.random.PRNGKey(0)
    k1, k2 = jax.random.split(key)

    # Small shape consistent with the module (single-block grid, padded dims).
    _run_case(k1, batch=2, seq=8, in_features=32, out_features=32, r=16)

    # Larger shape with explicit small tiles to exercise M padding, K
    # accumulation and N tiling: m=320 -> m_pad=384, main grid (3, 3, 2),
    # xA pre-pass grid (3, 2).
    _run_case(k2, batch=2, seq=160, in_features=256, out_features=384, r=16,
              tm=128, tn=128, tk=128)

    print("KERNEL_OK")
</pallas_src>

<mosaic_0001>
module attributes {stable_mosaic.version = 11 : i64} {
  func.func @_xa_kernel(%arg0: i32, %arg1: i32, %arg2: memref<16x128xbf16, #tpu.memory_space<vmem>>, %arg3: memref<128x128xbf16, #tpu.memory_space<vmem>>, %arg4: memref<16x128xbf16, #tpu.memory_space<vmem>>, %arg5: memref<16x128xf32, #tpu.memory_space<vmem>>) attributes {dimension_semantics = [#tpu.dimension_semantics<parallel>, #tpu.dimension_semantics<arbitrary>], iteration_bounds = array<i64: 1, 1>, scalar_prefetch = 0 : i64, scratch_operands = 1 : i64, tpu.core_type = #tpu.core_type<tc>, window_params = [{transform_indices = @transform_0, window_bounds = array<i64: 16, 128>}, {transform_indices = @transform_1, window_bounds = array<i64: 128, 128>}, {transform_indices = @transform_2, window_bounds = array<i64: 16, 128>}]} {
    %c0_i32 = arith.constant 0 : i32
    %0 = arith.cmpi eq, %arg1, %c0_i32 : i32
    %1 = arith.extui %0 : i1 to i32
    %c0_i32_0 = arith.constant 0 : i32
    %2 = arith.cmpi ne, %1, %c0_i32_0 : i32
    scf.if %2 {
      %cst_10 = arith.constant 0.000000e+00 : f32
      %12 = vector.broadcast %cst_10 : f32 to vector<16x128xf32>
      %c0_11 = arith.constant 0 : index
      %c0_12 = arith.constant 0 : index
      %13 = vector.load %arg5[%c0_11, %c0_12] : memref<16x128xf32, #tpu.memory_space<vmem>>, vector<16x128xf32>
      tpu.vector_store %arg5[%c0_11, %c0_12], %12 {strides = array<i32>} : memref<16x128xf32, #tpu.memory_space<vmem>>, vector<16x128xf32>,
    } else {
    }
    %c0 = arith.constant 0 : index
    %c0_1 = arith.constant 0 : index
    %3 = vector.load %arg5[%c0, %c0_1] : memref<16x128xf32, #tpu.memory_space<vmem>>, vector<16x128xf32>
    %c0_2 = arith.constant 0 : index
    %c0_3 = arith.constant 0 : index
    %4 = vector.load %arg2[%c0_2, %c0_3] : memref<16x128xbf16, #tpu.memory_space<vmem>>, vector<16x128xbf16>
    %c0_4 = arith.constant 0 : index
    %c0_5 = arith.constant 0 : index
    %5 = vector.load %arg3[%c0_4, %c0_5] : memref<128x128xbf16, #tpu.memory_space<vmem>>, vector<128x128xbf16>
    %cst = arith.constant dense<0.000000e+00> : vector<16x128xf32>
    %6 = tpu.matmul %4, %5, %cst {dimension_numbers = #tpu.dot_dimension_numbers<[1], [0], [0], [1], [0, 0, 1, 1], [], []>} : vector<16x128xbf16>, vector<128x128xbf16>, vector<16x128xf32> -> vector<16x128xf32>
    %7 = arith.addf %3, %6 : vector<16x128xf32>
    %c0_6 = arith.constant 0 : index
    %c0_7 = arith.constant 0 : index
    %8 = vector.load %arg5[%c0_6, %c0_7] : memref<16x128xf32, #tpu.memory_space<vmem>>, vector<16x128xf32>
    tpu.vector_store %arg5[%c0_6, %c0_7], %7 {strides = array<i32>} : memref<16x128xf32, #tpu.memory_space<vmem>>, vector<16x128xf32>,
    %c0_i32_8 = arith.constant 0 : i32
    %9 = arith.cmpi eq, %arg1, %c0_i32_8 : i32
    %10 = arith.extui %9 : i1 to i32
    %c0_i32_9 = arith.constant 0 : i32
    %11 = arith.cmpi ne, %10, %c0_i32_9 : i32
    scf.if %11 {
      %c0_10 = arith.constant 0 : index
      %c0_11 = arith.constant 0 : index
      %12 = vector.load %arg5[%c0_10, %c0_11] : memref<16x128xf32, #tpu.memory_space<vmem>>, vector<16x128xf32>
      %13 = arith.truncf %12 : vector<16x128xf32> to vector<16x128xbf16>
      %c0_12 = arith.constant 0 : index
      %c0_13 = arith.constant 0 : index
      %14 = vector.load %arg4[%c0_12, %c0_13] : memref<16x128xbf16, #tpu.memory_space<vmem>>, vector<16x128xbf16>
      tpu.vector_store %arg4[%c0_12, %c0_13], %13 {strides = array<i32>} : memref<16x128xbf16, #tpu.memory_space<vmem>>, vector<16x128xbf16>,
    } else {
    }
    return
  }
  func.func @transform_0(%arg0: i32, %arg1: i32) -> (i32, i32) {
    %c0_i32 = arith.constant 0 : i32
    return %arg0, %arg1 : i32, i32
  }
  func.func @transform_1(%arg0: i32, %arg1: i32) -> (i32, i32) {
    %c0_i32 = arith.constant 0 : i32
    %c0_i32_0 = arith.constant 0 : i32
    return %arg1, %c0_i32 : i32, i32
  }
  func.func @transform_2(%arg0: i32, %arg1: i32) -> (i32, i32) {
    %c0_i32 = arith.constant 0 : i32
    %c0_i32_0 = arith.constant 0 : i32
    return %arg0, %c0_i32 : i32, i32
  }
}

</mosaic_0001>

<bundles_post_ra>
// kernel: tpu_custom_call.1
= control target key start
LH: loop header
LB: loop body
LE: loop exit
PB: predicated region body
PF: predicated region fallthrough
CT: control target
= control target key end

     0   :  { %7 = vsyncpa [#allocation4], 0  ;;  %s342_s0 = inlined_call_operand.hbm [shape: bf16[16,128], index: 0, kind: input, shape index: {}]   ;;  %s343_s1 = inlined_call_operand.hbm [shape: bf16[128,128], index: 1, kind: input, shape index: {}]   ;;  %s344_s2 = inlined_call_operand.hbm [shape: bf16[16,128], index: 2, kind: output, shape index: {}]  }
   0x1   :  { %8 = vsyncpa [#allocation7], 0 }
   0x2   :  { %9 = vsyncpa [#allocation5], 0  ;;  %s14_s11 = sshll.u32 %s342_s0, 4  ;;  %s304_s12 = smov [#allocation3]   ;;  %s15_s11 = int_to_ptr.hbm [resolvable:$true] %s14_s11 }
   0x3   :  { %s16_s13 = sshll.u32 %s304_s12, 4  ;;  %s27_s16 = sshll.u32 %s343_s1, 4  ;;  %s17_s13 = int_to_ptr.vmem [resolvable:$true] %s16_s13  ;;  %s28_s16 = int_to_ptr.hbm [resolvable:$true] %s27_s16 }
   0x4   :  { %s305_s17 = smov 64   ;;  %s306_s18 = smov 4  }
   0x5   :  { %22 = dma.hbm_to_vmem [thread:$0]  %s15_s11, 128, %s17_s13, [#allocation4], %s305_s17, %s305_s17, %s306_s18  }
   0x6   :  { %s307_s19 = smov [#allocation6]  }
   0x7   :  { %s29_s20 = sshll.u32 %s307_s19, 4  ;;  %s30_s20 = int_to_ptr.vmem [resolvable:$true] %s29_s20 }
   0x8   :  { %35 = dma.hbm_to_vmem [thread:$0]  %s28_s16, 1024, %s30_s20, [#allocation7], %s305_s17, %s305_s17, %s306_s18  }
   0x9   :  { %298 = dma.done.wait [#allocation4], 128  }
   0xa   :  { %299 = vsyncadd [#allocation4], 4294967168 }
   0xb   :  { %300 = dma.done.wait [#allocation7], 1024  }
   0xc   :  { %301 = vsyncadd [#allocation7], 4294966272  ;;  %v215_v0 = vld [vmem:[#allocation6 + $0x38] sm:$0xff]  ;;  %v214_v1 = vld [vmem:[#allocation6 + $0x30] sm:$0xff]  ;;  %s308_s0 = smov [#allocation8]   ;;  %s157_s23 = sshll.u32 %s344_s2, 4  ;;  %s158_s23 = int_to_ptr.hbm [resolvable:$true] %s157_s23 }
   0xd   :  { %124 = vmatpush.bf16.msra.mxu0 %v215_v0  ;;  %v213_v2 = vld [vmem:[#allocation6 + $0x28] sm:$0xff]  ;;  %v212_v3 = vld [vmem:[#allocation6 + $0x20] sm:$0xff]  ;;  %v211_v4 = vld [vmem:[#allocation6 + $0x18] sm:$0xff]  ;;  %s155_s1 = sshll.u32 %s308_s0, 4  ;;  %s156_s1 = int_to_ptr.vmem [resolvable:$true] %s155_s1 }
   0xe   :  { %v210_v5 = vld [vmem:[#allocation6 + $0x10] sm:$0xff]  ;;  %v209_v6 = vld [vmem:[#allocation6 + $0x8] sm:$0xff]  ;;  %v208_v7 = vld [vmem:[#allocation6] sm:$0xff] }
   0xf   :  { %v207_v8 = vld [vmem:[#allocation3] sm:$0xff] }
  0x11   :  { %125 = vmatpush.bf16.msra.mxu0 %v214_v1 }
  0x15   :  { %126 = vmatpush.bf16.msra.mxu0 %v213_v2 }
  0x19   :  { %127 = vmatpush.bf16.msra.mxu0 %v212_v3 }
  0x1d   :  { %128 = vmatpush.bf16.msra.mxu0 %v211_v4 }
  0x21   :  { %129 = vmatpush.bf16.msra.mxu0 %v210_v5 }
  0x25   :  { %130 = vmatpush.bf16.msra.mxu0 %v209_v6 }
  0x29   :  { %131 = vmatpush.bf16.msra.mxu0 %v208_v7 }
  0x2c   :  { %132 = vmatmul.bf16.vlgmr.msra.gmra.mxu0 %v207_v8 }
  0xa9   :  { %v133_v9 = vpop.f32.mrf.mxu0 }
  0xb1   :  { %v135_v10 = vpop.f32.mrf.mxu0 }
  0xb2   :  { %v219_v11 = vpack.c.bf16 %v135_v10, %v133_v9 }
  0xb4   :  { %220 = vst [vmem:[#allocation8] sm:$0xff] %v219_v11  }
  0xb5   :  { %163 = dma.vmem_to_hbm [thread:$0]  %s156_s1, 128, %s158_s23, [#allocation5], %s305_s17, %s305_s17, %s306_s18  }
  0xb6   :  { %302 = dma.done.wait [#allocation5], 128  }
  0xb7   :  { %303 = vsyncadd [#allocation5], 4294967168 }
  0xb8   :  { %168 = vsyncpa [#allocation4], 1 }
  0xb9   :  { %169 = vsyncpa [#allocation7], 1 }
  0xba   :  { %170 = vsyncpa [#allocation5], 1 }

</bundles_post_ra>
